<compile_context>
chip_gen: v6e
topology: v6e:2x2x1
jax: 0.10.0
libtpu: 0.0.40
codegen_flags: <defaults>
</compile_context>

<pallas_src>
import math

import jax
import jax.numpy as jnp
from jax.experimental import pallas as pl
from jax.experimental.pallas import tpu as pltpu


def _affine_const_kernel(x_ref, st_ref, z_ref):
    # Hot path: one fused mul-add per vreg.  st_ref holds [exp(s); t] stacked
    # as (2, D_f); each (1, D_f) row broadcasts over the sublane (batch) axis.
    x = x_ref[...].astype(z_ref.dtype)
    z_ref[...] = x * st_ref[0:1, :] + st_ref[1:2, :]


def _lcm(a, b):
    return a * b // math.gcd(a, b)


def _round_up(a, m):
    return -(-a // m) * m


def affine_constant_flow_forward(x, s, t, *, target_block_bytes=8 * 1024 * 1024):
    """Returns (z, log_det) matching the PyTorch forward exactly."""
    N, D = x.shape
    assert s.shape == (1, D) and t.shape == (1, D)

    # PyTorch type promotion: affine computed in the promoted dtype.
    out_dtype = jnp.result_type(x.dtype, s.dtype, t.dtype)
    x_item = jnp.dtype(x.dtype).itemsize
    z_item = jnp.dtype(out_dtype).itemsize

    # --- hoisted out of the kernel (trivial (1, D) work, done once) ---------
    log_det = jnp.sum(s.astype(jnp.float32), axis=1).astype(s.dtype)       # (1,)
    exp_s = jnp.exp(s.astype(jnp.float32)).astype(out_dtype)               # (1, D)
    t_c = t.astype(out_dtype)                                              # (1, D)

    # --- lane-dense folding: pack K rows into one row of width K*D ----------
    # Only when D < 128 (largest masked-store penalty) and N % K == 0 (so no
    # pad / slice copies are ever introduced).
    K = 1
    if D < 128:
        base = _lcm(D, 128) // D
        k = base
        while 2 * k * D <= 1024:           # widen toward ~1024 lanes when cheap
            k *= 2
        while k > base and N % k != 0:     # back off until N divides evenly
            k //= 2
        if N % k == 0:
            K = k
        elif N % base == 0:
            K = base
    D_f = K * D
    n_rows = N // K if K > 1 else N

    if K > 1:
        # TODO(synk): verify on xprof that this reshape stays cheap; if it
        # materializes a full HBM relayout copy, prefer K=1 (masked stores).
        x_in = x.reshape(n_rows, D_f)
        st = jnp.concatenate(
            [jnp.tile(exp_s, (1, K)), jnp.tile(t_c, (1, K))], axis=0)      # (2, D_f)
    else:
        x_in = x
        st = jnp.concatenate([exp_s, t_c], axis=0)                         # (2, D)

    # --- batch tiling with a generation-aware VMEM budget --------------------
    try:
        phys_vmem = int(pltpu.get_tpu_info().vmem_capacity_bytes)
    except Exception:
        phys_vmem = 64 << 20               # v7x per-TC physical (smallest gen)
    vmem_cap = (phys_vmem * 3) // 4        # leave compiler headroom

    # sublane packing multiple: 8 for f32, 16 for bf16, 32 for int8/fp8
    min_item = min(x_item, z_item)
    sub = 8 * max(1, 4 // min_item)

    tile_target = max(1, target_block_bytes // (D_f * x_item))
    per_row = D_f * (x_item + z_item)      # x block + z block, per folded row
    tile_vmem = max(1, (vmem_cap - (4 << 20)) // (2 * per_row))  # double-buffered
    tile_n = max(sub, min(tile_target, tile_vmem) // sub * sub)
    tile_n = min(tile_n, _round_up(n_rows, sub))
    if tile_n >= n_rows:
        tile_n = n_rows                    # full-extent block (always legal)

    grid = (pl.cdiv(n_rows, tile_n),)      # ragged last block masked by Pallas
    vmem_need = 2 * tile_n * per_row + 4 * D_f * z_item + (4 << 20)
    vmem_limit = int(min(max(vmem_need, 16 << 20), vmem_cap))

    z_out = pl.pallas_call(
        _affine_const_kernel,
        out_shape=jax.ShapeDtypeStruct((n_rows, D_f), out_dtype),
        grid=grid,
        in_specs=[
            pl.BlockSpec((tile_n, D_f), lambda i: (i, 0)),
            pl.BlockSpec((2, D_f), lambda i: (0, 0)),
        ],
        out_specs=pl.BlockSpec((tile_n, D_f), lambda i: (i, 0)),
        compiler_params=pltpu.CompilerParams(
            # "parallel" lets v7x shard batch tiles across both TensorCores;
            # no-op on single-TC v5e/v6e.
            dimension_semantics=("parallel",),
            vmem_limit_bytes=vmem_limit,
        ),
    )(x_in, st)

    z = z_out.reshape(N, D) if K > 1 else z_out
    return z, log_det


if __name__ == "__main__":
    key = jax.random.PRNGKey(0)
    kx, ks, kt = jax.random.split(key, 3)

    N, D = 8, 32                        # small, consistent with (N, dim) input
    x = jax.random.normal(kx, (N, D), dtype=jnp.float32)
    # Deterministic "learned" parameters (torch.randn(1, dim) equivalents).
    s = jax.random.normal(ks, (1, D), dtype=jnp.float32)
    t = jax.random.normal(kt, (1, D), dtype=jnp.float32)

    z, log_det = affine_constant_flow_forward(x, s, t)
    jax.block_until_ready((z, log_det))

    # Pure-JAX reference check.
    z_ref = x * jnp.exp(s) + t
    log_det_ref = jnp.sum(s, axis=1)
    assert z.shape == (N, D) and log_det.shape == (1,)
    assert jnp.allclose(z, z_ref, atol=1e-6, rtol=1e-6)
    assert jnp.allclose(log_det, log_det_ref, atol=1e-6, rtol=1e-6)

    print("KERNEL_OK")
</pallas_src>

<mosaic_0001>
module attributes {stable_mosaic.version = 11 : i64} {
  func.func @_affine_const_kernel(%arg0: i32, %arg1: memref<1x256xf32, #tpu.memory_space<vmem>>, %arg2: memref<2x256xf32, #tpu.memory_space<vmem>>, %arg3: memref<1x256xf32, #tpu.memory_space<vmem>>) attributes {dimension_semantics = [#tpu.dimension_semantics<parallel>], iteration_bounds = array<i64: 1>, scalar_prefetch = 0 : i64, scratch_operands = 0 : i64, tpu.core_type = #tpu.core_type<tc>, window_params = [{transform_indices = @transform_0, window_bounds = array<i64: 1, 256>}, {pipeline_mode = #tpu.pipeline_mode<synchronous>, transform_indices = @transform_1, window_bounds = array<i64: 2, 256>}, {transform_indices = @transform_2, window_bounds = array<i64: 1, 256>}]} {
    %c0 = arith.constant 0 : index
    %c0_0 = arith.constant 0 : index
    %0 = vector.load %arg1[%c0, %c0_0] : memref<1x256xf32, #tpu.memory_space<vmem>>, vector<1x256xf32>
    %c0_1 = arith.constant 0 : index
    %c0_2 = arith.constant 0 : index
    %1 = vector.load %arg2[%c0_1, %c0_2] : memref<2x256xf32, #tpu.memory_space<vmem>>, vector<1x256xf32>
    %2 = arith.mulf %0, %1 : vector<1x256xf32>
    %c1 = arith.constant 1 : index
    %c0_3 = arith.constant 0 : index
    %3 = vector.load %arg2[%c1, %c0_3] : memref<2x256xf32, #tpu.memory_space<vmem>>, vector<1x256xf32>
    %4 = arith.addf %2, %3 : vector<1x256xf32>
    %c0_4 = arith.constant 0 : index
    %c0_5 = arith.constant 0 : index
    %5 = vector.load %arg3[%c0_4, %c0_5] : memref<1x256xf32, #tpu.memory_space<vmem>>, vector<1x256xf32>
    tpu.vector_store %arg3[%c0_4, %c0_5], %4 {strides = array<i32>} : memref<1x256xf32, #tpu.memory_space<vmem>>, vector<1x256xf32>,
    return
  }
  func.func @transform_0(%arg0: i32) -> (i32, i32) {
    %c0_i32 = arith.constant 0 : i32
    %c0_i32_0 = arith.constant 0 : i32
    return %arg0, %c0_i32 : i32, i32
  }
  func.func @transform_1(%arg0: i32) -> (i32, i32) {
    %c0_i32 = arith.constant 0 : i32
    %c0_i32_0 = arith.constant 0 : i32
    %c0_i32_1 = arith.constant 0 : i32
    return %c0_i32, %c0_i32_0 : i32, i32
  }
  func.func @transform_2(%arg0: i32) -> (i32, i32) {
    %c0_i32 = arith.constant 0 : i32
    %c0_i32_0 = arith.constant 0 : i32
    return %arg0, %c0_i32 : i32, i32
  }
}

</mosaic_0001>

<bundles_post_ra>
// kernel: tpu_custom_call.1
= control target key start
LH: loop header
LB: loop body
LE: loop exit
PB: predicated region body
PF: predicated region fallthrough
CT: control target
= control target key end

     0   :  { %7 = vsyncpa [#allocation3], 0  ;;  %s159_s0 = inlined_call_operand.hbm [shape: f32[1,256], index: 0, kind: input, shape index: {}]   ;;  %s160_s1 = inlined_call_operand.hbm [shape: f32[2,256], index: 1, kind: input, shape index: {}]   ;;  %s161_s2 = inlined_call_operand.hbm [shape: f32[1,256], index: 2, kind: output, shape index: {}]  }
   0x1   :  { %8 = vsyncpa [#allocation6], 0 }
   0x2   :  { %9 = vsyncpa [#allocation4], 0  ;;  %s132_s9 = smov [#allocation2]   ;;  %s133_s11 = smov [#allocation5]  }
   0x3   :  { %s16_s10 = sshll.u32 %s132_s9, 4  ;;  %s26_s12 = sshll.u32 %s133_s11, 4  ;;  %s17_s10 = int_to_ptr.vmem [resolvable:$true] %s16_s10  ;;  %s27_s12 = int_to_ptr.vmem [resolvable:$true] %s26_s12 }
   0x4   :  { %s74_s13 = scalar_lea.vmem %s17_s10, 32  ;;  %p79_p1 = scmp.lt.s32.totalorder %s17_s10, %s17_s10 }
   0x5   :  { %p75_p0 = scmp.ne.s32.totalorder %s17_s10, %s74_s13  ;;  %p80_p2 = scmp.lt.s32.totalorder %s74_s13, %s74_s13 }
   0x7   :  { %p81_p3 = por %p80_p2, %p79_p1 }
   0x9   :  { %p82_p4 = pnand %p81_p3, %p75_p0 }
   0xb   :  { %85 = shalt.err (!%p82_p4)
}
   0xc   :  { %19 = dma.hbm_to_vmem [thread:$0]  %s159_s0, 32, %s17_s10, [#allocation3]  }
   0xd   :  { %s94_s16 = scalar_lea.vmem %s27_s12, 64  ;;  %p99_p6 = scmp.lt.s32.totalorder %s27_s12, %s27_s12 }
   0xe   :  { %p95_p5 = scmp.ne.s32.totalorder %s27_s12, %s94_s16  ;;  %p100_p7 = scmp.lt.s32.totalorder %s94_s16, %s94_s16 }
  0x10   :  { %p101_p8 = por %p100_p7, %p99_p6 }
  0x12   :  { %p102_p9 = pnand %p101_p8, %p95_p5 }
  0x14   :  { %105 = shalt.err (!%p102_p9)
}
  0x15   :  { %29 = dma.hbm_to_vmem [thread:$0]  %s160_s1, 64, %s27_s12, [#allocation6]  }
  0x16   :  { %126 = dma.done.wait [#allocation3], 32  }
  0x17   :  { %127 = vsyncadd [#allocation3], 4294967264 }
  0x18   :  { %128 = dma.done.wait [#allocation6], 64  }
  0x19   :  { %129 = vsyncadd [#allocation6], 4294967232  ;;  %v42_v0 = vlaneseq  ;;  %v36_v1 = vld [vmem:[#allocation2] sm:$0x3]  ;;  %s134_s19 = smov [#allocation7]  }
  0x1a   :  { %v37_v2 = vld [vmem:[#allocation5] ss:$2 sm:$0x3]  ;;  %s53_s0 = sshll.u32 %s134_s19, 4  ;;  %s54_s0 = int_to_ptr.vmem [resolvable:$true] %s53_s0 }
  0x1b   :  { %v38_v3 = vmul.f32 %v37_v2, %v36_v1  ;;  %v40_v4 = vld [vmem:[#allocation5 + $0x1] ss:$2 sm:$0x3]  ;;  %vm44_vm0 = vcmp.lt.s32.totalorder %v42_v0, 256  ;;  %s106_s20 = scalar_lea.vmem %s54_s0, 32  ;;  %p111_p11 = scmp.lt.s32.totalorder %s54_s0, %s54_s0 }
  0x1c   :  { %p107_p10 = scmp.ne.s32.totalorder %s54_s0, %s106_s20  ;;  %p112_p12 = scmp.lt.s32.totalorder %s106_s20, %s106_s20 }
  0x1d   :  { %v41_v5 = vadd.f32 %v40_v4, %v38_v3 }
  0x1e   :  { %p113_p13 = por %p112_p12, %p111_p11 }
  0x1f   :  { %46 = vst.msk [vmem:[#allocation7] sm:$0x3] %vm44_vm0, %v41_v5 }
  0x20   :  { %p114_p0 = pnand %p113_p13, %p107_p10 }
  0x22   :  { %117 = shalt.err (!%p114_p0)
}
  0x23   :  { %56 = dma.vmem_to_hbm [thread:$0]  %s54_s0, 32, %s161_s2, [#allocation4]  }
  0x24   :  { %130 = dma.done.wait [#allocation4], 32  }
  0x25   :  { %131 = vsyncadd [#allocation4], 4294967264 }
  0x26   :  { %60 = vsyncpa [#allocation3], 1 }
  0x27   :  { %61 = vsyncpa [#allocation6], 1 }
  0x28   :  { %62 = vsyncpa [#allocation4], 1 }

</bundles_post_ra>
